<compile_context>
chip_gen: v7x
topology: tpu7x:2x2x1
jax: 0.10.0
libtpu: 0.0.40
codegen_flags: <defaults>
</compile_context>

<pallas_src>
import numpy as np
import jax
import jax.numpy as jnp
from jax import lax
from jax.experimental import pallas as pl
from jax.experimental.pallas import tpu as pltpu


# ---------------------------------------------------------------------------
# Deterministic weight construction (mirrors make_multi_width_weights + the
# mean-subtraction done in RESET_WEIGHTS).
# ---------------------------------------------------------------------------
def make_multi_width_weights(n_in_channels, n_out_channels, filter_size,
                             sig_w, in_neurons, out_neurons):
    blocks = None
    for _out_ind in range(n_out_channels):
        if _out_ind == 0:
            diff_angle = (
                np.linspace(0, 2 * np.pi, in_neurons, endpoint=False).reshape((in_neurons, 1))
                - np.linspace(0, 2 * np.pi, out_neurons, endpoint=False).reshape((1, out_neurons))
            )
            w = np.exp((np.cos(diff_angle) - 1) / sig_w ** 2)
            w /= np.linalg.norm(w[:, 0]) * np.sqrt(in_neurons)
            blocks = w
        else:
            raise NotImplementedError("Multi widths with multiple filters not implemented.")
    return blocks


def build_params(dims, sig_w, key):
    """Layer weights in torch layout (out, in) + readout as a (dims[-1], 1) column."""
    ws_t = []
    for ind in range(len(dims) - 1):
        W = make_multi_width_weights(1, 1, 1, sig_w, dims[ind], dims[ind + 1])
        W = W - W.mean()                                   # RESET_WEIGHTS: W -= W.mean()
        # torch stores Linear weight as W.T (shape (out, in)); keep that layout
        # because the transposed kernel computes h_new = W_torch @ h.
        ws_t.append(jnp.asarray(W.T, dtype=jnp.float32))   # (out, in)
    # Readout: torch.nn.Linear(dims[-1], 1, bias=False) default init is
    # uniform(-1/sqrt(in), 1/sqrt(in)); reproduce deterministically with JAX.
    bound = 1.0 / np.sqrt(dims[-1])
    ro = jax.random.uniform(key, (dims[-1], 1), dtype=jnp.float32,
                            minval=-bound, maxval=bound)   # (D_last, 1)
    return ws_t, ro


# ---------------------------------------------------------------------------
# Pallas kernel: whole MLP + readout on one batch tile.
# ---------------------------------------------------------------------------
def make_mlp_kernel(n_layers, use_bf16):
    cdt = jnp.bfloat16 if use_bf16 else jnp.float32
    nt_dims = (((1,), (1,)), ((), ()))     # contract feature axes of W and x

    def kernel(x_ref, *refs):
        w_refs = refs[:n_layers]
        ro_ref = refs[n_layers]
        o_ref = refs[n_layers + 1]

        # x block arrives in its natural (tb, d_in) layout.  First layer
        # contracts the feature dims of W (out, in) and x (tb, in) directly,
        # producing (out, tb): from here on the batch sits on the lane axis.
        xb = x_ref[...].astype(cdt)
        h = lax.dot_general(w_refs[0][...].astype(cdt), xb,
                            dimension_numbers=nt_dims,
                            preferred_element_type=jnp.float32)   # MXU, f32 acc
        h = jnp.maximum(h, 0.0)                                   # VPU ReLU (f32)

        for w_ref in w_refs[1:]:
            h = jnp.dot(w_ref[...].astype(cdt), h.astype(cdt),
                        preferred_element_type=jnp.float32)       # (d_out, tb)
            h = jnp.maximum(h, 0.0)

        # N=1 readout off the MXU: f32 VPU multiply + sublane (XLU) reduction.
        # Result (1, tb) is lane-dense, so the store is an unmasked vst.
        o_ref[...] = jnp.sum(h * ro_ref[...], axis=0, keepdims=True)

    return kernel


def _round_up(x, m):
    return ((x + m - 1) // m) * m


def model_forward_pallas(x, layer_ws_t, ro_w, *, tb_max=4096, use_bf16=True):
    """x: (B, N) f32; layer_ws_t: list of (out, in) f32; ro_w: (D_last, 1) f32.

    Returns (B, 1) f32 == RO(relu(...relu(x @ W0.T)...)).
    """
    n_layers = len(layer_ws_t)
    B, N = x.shape
    D_last = ro_w.shape[0]

    # ---- batch tiling -----------------------------------------------------
    # Big tiles amortize the fixed per-grid-step cost; keep >= 2 steps when
    # there is enough work so megacore (v7x) can split the "parallel" axis.
    tb_max = max(128, min(int(tb_max), 16384))
    B128 = _round_up(B, 128)
    grid_n = pl.cdiv(B128, tb_max)
    if B128 >= 256:
        grid_n = max(grid_n, 2)
    if grid_n > 1 and grid_n % 2:
        grid_n += 1                           # even step count for 2 TCs
    tb = _round_up(pl.cdiv(B128, grid_n), 128)
    grid_n = pl.cdiv(B128, tb)                # drop fully-out-of-bounds steps

    # x is streamed untouched (no host transpose / pad): the last tile is
    # ragged; OOB reads only affect OOB batch columns and OOB output lanes are
    # discarded by Pallas on write-back.
    in_specs = (
        [pl.BlockSpec((tb, N), lambda i: (i, 0))]                        # streamed
        + [pl.BlockSpec(w.shape, lambda i: (0, 0)) for w in layer_ws_t]  # resident
        + [pl.BlockSpec(ro_w.shape, lambda i: (0, 0))]                   # resident
    )
    out_spec = pl.BlockSpec((1, tb), lambda i: (0, i))

    flops = 2 * grid_n * tb * (
        sum(int(w.shape[0]) * int(w.shape[1]) for w in layer_ws_t) + D_last)
    bytes_accessed = 4 * (B * N + B
                          + sum(int(w.size) for w in layer_ws_t) + int(ro_w.size))

    out_t = pl.pallas_call(
        make_mlp_kernel(n_layers, use_bf16),
        out_shape=jax.ShapeDtypeStruct((1, B), jnp.float32),
        grid=(grid_n,),
        in_specs=in_specs,
        out_specs=out_spec,
        compiler_params=pltpu.CompilerParams(
            dimension_semantics=("parallel",)),       # megacore sharding on v7x
        cost_estimate=pl.CostEstimate(flops=flops, transcendentals=0,
                                      bytes_accessed=bytes_accessed),
    )(x, *layer_ws_t, ro_w)

    return out_t.reshape(B, 1)


def model_forward(x, layer_ws_t, ro_w, *, tb_max=4096, use_bf16=True,
                  use_pallas=None):
    """Dispatcher: tiny batches go to plain XLA (launch/padding overhead wins)."""
    B = x.shape[0]
    if use_pallas is None:
        use_pallas = B >= 1024
    if not use_pallas:
        return model_forward_ref(x, layer_ws_t, ro_w)
    return model_forward_pallas(x, layer_ws_t, ro_w,
                                tb_max=tb_max, use_bf16=use_bf16)


# ---------------------------------------------------------------------------
# Pure-JAX reference for correctness checking (torch semantics: x @ W_torch.T).
# Use HIGHEST precision so the reference itself is true f32.
# ---------------------------------------------------------------------------
def model_forward_ref(x, layer_ws_t, ro_w):
    h = x
    for wt in layer_ws_t:
        h = jnp.maximum(jnp.dot(h, wt.T, precision=lax.Precision.HIGHEST), 0.0)
    return jnp.dot(h, ro_w, precision=lax.Precision.HIGHEST)


if __name__ == "__main__":
    # Small shapes consistent with the module: args.N=32, args.Nhid=64,
    # args.n_layers=2, args.sig_w=1.0  ->  dims = [32, 64, 64]
    N, Nhid, n_layers, sig_w = 32, 64, 2, 1.0
    dims = [N] + [Nhid] * n_layers

    key = jax.random.PRNGKey(0)
    k_x1, k_x2, k_ro = jax.random.split(key, 3)

    layer_ws_t, ro_w = build_params(dims, sig_w, k_ro)

    # 1) Tiny batch, exact f32 path (forced through the Pallas kernel).
    x_small = jax.random.normal(k_x1, (8, N), dtype=jnp.float32)
    out_f32 = jax.block_until_ready(
        model_forward(x_small, layer_ws_t, ro_w, use_pallas=True, use_bf16=False))
    ref_small = model_forward_ref(x_small, layer_ws_t, ro_w)
    np.testing.assert_allclose(np.asarray(out_f32), np.asarray(ref_small),
                               rtol=1e-4, atol=1e-5)
    assert out_f32.shape == (8, 1)

    # 2) Tiny batch, default bf16-operand path (f32 accumulation).
    out_bf16 = jax.block_until_ready(
        model_forward(x_small, layer_ws_t, ro_w, use_pallas=True))
    np.testing.assert_allclose(np.asarray(out_bf16), np.asarray(ref_small),
                               rtol=3e-2, atol=3e-3)

    # 3) Ragged batch (not a multiple of 128) exercising the >=2-step grid.
    x_med = jax.random.normal(k_x2, (700, N), dtype=jnp.float32)
    out_med = jax.block_until_ready(
        model_forward(x_med, layer_ws_t, ro_w, use_pallas=True))
    ref_med = model_forward_ref(x_med, layer_ws_t, ro_w)
    np.testing.assert_allclose(np.asarray(out_med), np.asarray(ref_med),
                               rtol=3e-2, atol=3e-3)
    assert out_med.shape == (700, 1)

    print("KERNEL_OK")
</pallas_src>

<mosaic_0001>
module attributes {stable_mosaic.version = 11 : i64} {
  func.func @kernel(%arg0: i32, %arg1: memref<128x32xf32, #tpu.memory_space<vmem>>, %arg2: memref<64x32xf32, #tpu.memory_space<vmem>>, %arg3: memref<64x64xf32, #tpu.memory_space<vmem>>, %arg4: memref<64x1xf32, #tpu.memory_space<vmem>>, %arg5: memref<1x128xf32, #tpu.memory_space<vmem>>) attributes {dimension_semantics = [#tpu.dimension_semantics<parallel>], iteration_bounds = array<i64: 1>, scalar_prefetch = 0 : i64, scratch_operands = 0 : i64, tpu.core_type = #tpu.core_type<tc>, window_params = [{transform_indices = @transform_0, window_bounds = array<i64: 128, 32>}, {pipeline_mode = #tpu.pipeline_mode<synchronous>, transform_indices = @transform_1, window_bounds = array<i64: 64, 32>}, {pipeline_mode = #tpu.pipeline_mode<synchronous>, transform_indices = @transform_2, window_bounds = array<i64: 64, 64>}, {pipeline_mode = #tpu.pipeline_mode<synchronous>, transform_indices = @transform_3, window_bounds = array<i64: 64, 1>}, {transform_indices = @transform_4, window_bounds = array<i64: 1, 128>}]} {
    %c0 = arith.constant 0 : index
    %c0_0 = arith.constant 0 : index
    %0 = vector.load %arg1[%c0, %c0_0] : memref<128x32xf32, #tpu.memory_space<vmem>>, vector<128x32xf32>
    %c0_1 = arith.constant 0 : index
    %c0_2 = arith.constant 0 : index
    %1 = vector.load %arg2[%c0_1, %c0_2] : memref<64x32xf32, #tpu.memory_space<vmem>>, vector<64x32xf32>
    %cst = arith.constant dense<0.000000e+00> : vector<64x128xf32>
    %2 = tpu.matmul %1, %0, %cst {dimension_numbers = #tpu.dot_dimension_numbers<[1], [1], [0], [0], [0, 0, 1, 0], [], []>} : vector<64x32xf32>, vector<128x32xf32>, vector<64x128xf32> -> vector<64x128xf32>
    %cst_3 = arith.constant 0.000000e+00 : f32
    %3 = vector.broadcast %cst_3 : f32 to vector<64x128xf32>
    %4 = arith.maximumf %2, %3 : vector<64x128xf32>
    %c0_4 = arith.constant 0 : index
    %c0_5 = arith.constant 0 : index
    %5 = vector.load %arg3[%c0_4, %c0_5] : memref<64x64xf32, #tpu.memory_space<vmem>>, vector<64x64xf32>
    %cst_6 = arith.constant dense<0.000000e+00> : vector<64x128xf32>
    %6 = tpu.matmul %5, %4, %cst_6 {dimension_numbers = #tpu.dot_dimension_numbers<[1], [0], [0], [1], [0, 0, 1, 1], [], []>} : vector<64x64xf32>, vector<64x128xf32>, vector<64x128xf32> -> vector<64x128xf32>
    %cst_7 = arith.constant 0.000000e+00 : f32
    %7 = vector.broadcast %cst_7 : f32 to vector<64x128xf32>
    %8 = arith.maximumf %6, %7 : vector<64x128xf32>
    %c0_8 = arith.constant 0 : index
    %c0_9 = arith.constant 0 : index
    %9 = vector.load %arg4[%c0_8, %c0_9] : memref<64x1xf32, #tpu.memory_space<vmem>>, vector<64x1xf32>
    %10 = vector.broadcast %9 : vector<64x1xf32> to vector<64x128xf32>
    %11 = arith.mulf %8, %10 : vector<64x128xf32>
    %cst_10 = arith.constant dense<0.000000e+00> : vector<128xf32>
    %12 = vector.multi_reduction <add>, %11, %cst_10 [0] : vector<64x128xf32> to vector<128xf32>
    %13 = vector.shape_cast %12 : vector<128xf32> to vector<1x128xf32>
    %c0_11 = arith.constant 0 : index
    %c0_12 = arith.constant 0 : index
    %14 = vector.load %arg5[%c0_11, %c0_12] : memref<1x128xf32, #tpu.memory_space<vmem>>, vector<1x128xf32>
    tpu.vector_store %arg5[%c0_11, %c0_12], %13 {strides = array<i32>} : memref<1x128xf32, #tpu.memory_space<vmem>>, vector<1x128xf32>,
    return
  }
  func.func @transform_0(%arg0: i32) -> (i32, i32) {
    %c0_i32 = arith.constant 0 : i32
    %c0_i32_0 = arith.constant 0 : i32
    return %arg0, %c0_i32 : i32, i32
  }
  func.func @transform_1(%arg0: i32) -> (i32, i32) {
    %c0_i32 = arith.constant 0 : i32
    %c0_i32_0 = arith.constant 0 : i32
    %c0_i32_1 = arith.constant 0 : i32
    return %c0_i32, %c0_i32_0 : i32, i32
  }
  func.func @transform_2(%arg0: i32) -> (i32, i32) {
    %c0_i32 = arith.constant 0 : i32
    %c0_i32_0 = arith.constant 0 : i32
    %c0_i32_1 = arith.constant 0 : i32
    return %c0_i32, %c0_i32_0 : i32, i32
  }
  func.func @transform_3(%arg0: i32) -> (i32, i32) {
    %c0_i32 = arith.constant 0 : i32
    %c0_i32_0 = arith.constant 0 : i32
    %c0_i32_1 = arith.constant 0 : i32
    return %c0_i32, %c0_i32_0 : i32, i32
  }
  func.func @transform_4(%arg0: i32) -> (i32, i32) {
    %c0_i32 = arith.constant 0 : i32
    %c0_i32_0 = arith.constant 0 : i32
    return %c0_i32, %arg0 : i32, i32
  }
}

</mosaic_0001>

<bundles_post_ra>
// kernel: tpu_custom_call.1
= control target key start
LH: loop header
LB: loop body
LE: loop exit
PB: predicated region body
PF: predicated region fallthrough
CT: control target
= control target key end

     0   :  { %vm42_vm0 = vcmask 261120   ;;  %s907_s0 = inlined_call_operand.vmem [shape: f32[8,32], index: 0, kind: input, shape index: {}]   ;;  %s908_s1 = inlined_call_operand.vmem [shape: f32[64,32], index: 1, kind: input, shape index: {}]   ;;  %s909_s2 = inlined_call_operand.vmem [shape: f32[64,64], index: 2, kind: input, shape index: {}]   ;;  %s910_s3 = inlined_call_operand.vmem [shape: f32[64,1], index: 3, kind: input, shape index: {}]   ;;  %s911_s4 = inlined_call_operand.hbm [shape: f32[1,8], index: 4, kind: output, shape index: {}]  }
   0x1   :  { %v18_v0 = vld [vmem:[%s907_s0] sm:$0xff]  ;;  %v19_v1 = vld [vmem:[%s907_s0 + $0x8] sm:$0xff]  ;;  %v20_v2 = vld [vmem:[%s907_s0 + $0x10] sm:$0xff] }
   0x2   :  { %v602_v3 = vpack.c.bf16 %v19_v1, %v18_v0  ;;  %vm732_vm1 = vmpackc.low %vm42_vm0, %vm42_vm0  ;;  %v21_v5 = vld [vmem:[%s907_s0 + $0x18] sm:$0xff]  ;;  %v34_v7 = vld [vmem:[%s908_s1] sm:$0xff] }
   0x3   :  { %v608_v6 = vpack.c.bf16 %v21_v5, %v20_v2  ;;  %v22_v8 = vld [vmem:[%s907_s0 + $0x20] sm:$0xff]  ;;  %v23_v9 = vld [vmem:[%s907_s0 + $0x28] sm:$0xff]  ;;  %562 = vmatprep.mubr.msk.f32.mxu0 %vm42_vm0, %v34_v7 }
   0x4   :  { %604 = vmatprep.subr.msk.bf16.mxu0 %vm732_vm1, %v602_v3 }
   0x5   :  { %607 = vmatpush3.bf16.xpose.msk.msra.mxu0 %vm732_vm1, %v602_v3 }
   0x6   :  { %610 = vmatprep.subr.msk.bf16.mxu0 %vm732_vm1, %v608_v6 }
   0x7   :  { %9 = vsyncpa [#allocation3], 0  ;;  %v614_v10 = vpack.c.bf16 %v23_v9, %v22_v8  ;;  %v24_v11 = vld [vmem:[%s907_s0 + $0x30] sm:$0xff]  ;;  %v25_v12 = vld [vmem:[%s907_s0 + $0x38] sm:$0xff]  ;;  %vm236_vm2 = vcmask 523264   ;;  %v694_v36 = vmov 0  }
   0x8   :  { %v620_v13 = vpack.c.bf16 %v25_v12, %v24_v11  ;;  %v26_v14 = vld [vmem:[%s907_s0 + $0x40] sm:$0xff]  ;;  %v27_v15 = vld [vmem:[%s907_s0 + $0x48] sm:$0xff]  ;;  %v28_v17 = vld [vmem:[%s907_s0 + $0x50] sm:$0xff]  ;;  %668 = vset.pattern.permute.xlu0 %v694_v36  ;;  %669 = vset.pattern.permute.xlu1 %v694_v36 }
   0x9   :  { %v626_v16 = vpack.c.bf16 %v27_v15, %v26_v14  ;;  %v29_v18 = vld [vmem:[%s907_s0 + $0x58] sm:$0xff]  ;;  %v30_v20 = vld [vmem:[%s907_s0 + $0x60] sm:$0xff]  ;;  %v31_v21 = vld [vmem:[%s907_s0 + $0x68] sm:$0xff] }
   0xa   :  { %v632_v19 = vpack.c.bf16 %v29_v18, %v28_v17  ;;  %v638_v22 = vpack.c.bf16 %v31_v21, %v30_v20  ;;  %v32_v23 = vld [vmem:[%s907_s0 + $0x70] sm:$0xff]  ;;  %v33_v24 = vld [vmem:[%s907_s0 + $0x78] sm:$0xff]  ;;  %v35_v26 = vld [vmem:[%s908_s1 + $0x8] sm:$0xff] }
   0xb   :  { %v644_v25 = vpack.c.bf16 %v33_v24, %v32_v23  ;;  %v36_v27 = vld [vmem:[%s908_s1 + $0x10] sm:$0xff]  ;;  %v37_v28 = vld [vmem:[%s908_s1 + $0x18] sm:$0xff]  ;;  %v38_v29 = vld [vmem:[%s908_s1 + $0x20] sm:$0xff] }
   0xc   :  { %v39_v30 = vld [vmem:[%s908_s1 + $0x28] sm:$0xff]  ;;  %v40_v31 = vld [vmem:[%s908_s1 + $0x30] sm:$0xff]  ;;  %v41_v32 = vld [vmem:[%s908_s1 + $0x38] sm:$0xff] }
   0xd   :  { %613 = vmatpush3.bf16.xpose.msk.msra.mxu0 %vm732_vm1, %v608_v6  ;;  %v228_v33 = vld [vmem:[%s909_s2] sm:$0xff]  ;;  %v376_v35 = vld [vmem:[%s910_s3 + $0x10] sm:$0xff]  ;;  %v375_v37 = vld [vmem:[%s910_s3 + $0x8] sm:$0xff] }
   0xe   :  { %616 = vmatprep.subr.msk.bf16.mxu0 %vm732_vm1, %v614_v10  ;;  %590 = vmatprep.mubr.msk.f32.mxu1 %vm236_vm2, %v228_v33  ;;  %v374_v34 = vld [vmem:[%s910_s3] sm:$0xff]  ;;  %v377_v38 = vld [vmem:[%s910_s3 + $0x18] sm:$0xff]  ;;  %v379_v40 = vld [vmem:[%s910_s3 + $0x28] sm:$0xff] }
   0xf   :  { %384 = vperm.xlu0 %668, %v374_v34   ;;  %394 = vperm.xlu1 %669, %v376_v35   ;;  %v378_v39 = vld [vmem:[%s910_s3 + $0x20] sm:$0xff]  ;;  %v380_v41 = vld [vmem:[%s910_s3 + $0x30] sm:$0xff]  ;;  %v381_v42 = vld [vmem:[%s910_s3 + $0x38] sm:$0xff] }
  0x10   :  { %v229_v63 = vld [vmem:[%s909_s2 + $0x8] sm:$0xff]  ;;  %v230_v0 = vld [vmem:[%s909_s2 + $0x10] sm:$0xff]  ;;  %v231_v1 = vld [vmem:[%s909_s2 + $0x18] sm:$0xff] }
  0x11   :  { %v232_v2 = vld [vmem:[%s909_s2 + $0x20] sm:$0xff]  ;;  %v233_v3 = vld [vmem:[%s909_s2 + $0x28] sm:$0xff]  ;;  %v234_v4 = vld [vmem:[%s909_s2 + $0x30] sm:$0xff] }
  0x12   :  { %v235_v5 = vld [vmem:[%s909_s2 + $0x38] sm:$0xff]  ;;  %s695_s2 = smov [#allocation2]  }
  0x13   :  { %389 = vperm.xlu0 %668, %v375_v37   ;;  %399 = vperm.xlu1 %669, %v377_v38   ;;  %s450_s13 = sshll.u32 %s695_s2, 4  ;;  %s451_s13 = int_to_ptr.vmem [resolvable:$true] %s450_s13 }
  0x14   :  { %s670_s14 = scalar_lea.vmem %s451_s13, 16  ;;  %s674_s15 = scalar_lea.vmem %s451_s13, 32 }
  0x15   :  { %619 = vmatpush3.bf16.xpose.msk.msra.mxu0 %vm732_vm1, %v614_v10  ;;  %p671_p0 = scmp.ne.s32.totalorder %s451_s13, %s670_s14  ;;  %p675_p1 = scmp.lt.s32.totalorder %s451_s13, %s451_s13 }
  0x16   :  { %622 = vmatprep.subr.msk.bf16.mxu0 %vm732_vm1, %v620_v13  ;;  %p676_p2 = scmp.lt.s32.totalorder %s674_s15, %s670_s14 }
  0x17   :  { %404 = vperm.xlu0 %668, %v378_v39   ;;  %409 = vperm.xlu1 %669, %v379_v40  }
  0x18   :  { %p677_p3 = por %p676_p2, %p675_p1 }
  0x1a   :  { %p678_p4 = pnand %p677_p3, %p671_p0 }
  0x1b   :  { %414 = vperm.xlu0 %668, %v380_v41   ;;  %419 = vperm.xlu1 %669, %v381_v42  }
  0x1d   :  { %625 = vmatpush3.bf16.xpose.msk.msra.mxu0 %vm732_vm1, %v620_v13 }
  0x1e   :  { %628 = vmatprep.subr.msk.bf16.mxu0 %vm732_vm1, %v626_v16 }
  0x25   :  { %631 = vmatpush3.bf16.xpose.msk.msra.mxu0 %vm732_vm1, %v626_v16 }
  0x26   :  { %634 = vmatprep.subr.msk.bf16.mxu0 %vm732_vm1, %v632_v19 }
  0x2d   :  { %637 = vmatpush3.bf16.xpose.msk.msra.mxu0 %vm732_vm1, %v632_v19 }
  0x2e   :  { %640 = vmatprep.subr.msk.bf16.mxu0 %vm732_vm1, %v638_v22 }
  0x35   :  { %643 = vmatpush3.bf16.xpose.msk.msra.mxu0 %vm732_vm1, %v638_v22 }
  0x36   :  { %646 = vmatprep.subr.msk.bf16.mxu0 %vm732_vm1, %v644_v25 }
  0x3d   :  { %649 = vmatpush3.bf16.xpose.msk.msra.mxu0 %vm732_vm1, %v644_v25 }
  0x44   :  { %563 = vmatmul.mubr.msk.f32.vlgmr.msra.gmra.mrb[0].mxu0 %vm42_vm0, %v35_v26 }
  0x45   :  { %565 = vmatprep.mubr.msk.f32.mxu0 %vm42_vm0, %v36_v27 }
  0x48   :  { %566 = vmatmul.mubr.msk.f32.gmra.mrb[2].mxu0 %vm42_vm0, %v37_v28 }
  0x49   :  { %568 = vmatprep.mubr.msk.f32.mxu0 %vm42_vm0, %v38_v29 }
  0x4c   :  { %569 = vmatmul.mubr.msk.f32.gmra.mrb[4].mxu0 %vm42_vm0, %v39_v30 }
  0x4d   :  { %571 = vmatprep.mubr.msk.f32.mxu0 %vm42_vm0, %v40_v31 }
  0x50   :  { %572 = vmatmul.mubr.msk.f32.gmra.mrb[6].mxu0 %vm42_vm0, %v41_v32 }
  0x8e   :  { %v385_v6 = vpop.permute.xlu0 %384  ;;  %v395_v7 = vpop.permute.xlu1 %394 }
  0x92   :  { %v390_v11 = vpop.permute.xlu0 %389  ;;  %v400_v16 = vpop.permute.xlu1 %399 }
  0x96   :  { %v405_v23 = vpop.permute.xlu0 %404  ;;  %v410_v29 = vpop.permute.xlu1 %409 }
  0x9a   :  { %v415_v38 = vpop.permute.xlu0 %414  ;;  %v420_v41 = vpop.permute.xlu1 %419 }
 0x117   :  { %v564_v43 = vpop.f32.mrb[0].mxu0 }
 0x118   :  { %v221_v44 = vmax.f32 %v564_v43, 0.0  ;;  %v181_v45 = vpop.f32.mrb[1].mxu0 }
 0x119   :  { %v220_v46 = vmax.f32 %v181_v45, 0.0 }
 0x11b   :  { %v567_v47 = vpop.f32.mrb[2].mxu0  ;;  %v650_v48 = vpack.c.bf16 %v221_v44, %v220_v46 }
 0x11c   :  { %v223_v49 = vmax.f32 %v567_v47, 0.0  ;;  %v191_v50 = vpop.f32.mrb[3].mxu0 }
 0x11d   :  { %v222_v51 = vmax.f32 %v191_v50, 0.0  ;;  %651 = vmatprep.subr.bf16.mxu1 %v650_v48 }
 0x11e   :  { %653 = vmatpush3.bf16.msra.mxu1 %v650_v48 }
 0x11f   :  { %v654_v52 = vpack.c.bf16 %v223_v49, %v222_v51  ;;  %v570_v53 = vpop.f32.mrb[4].mxu0 }
 0x120   :  { %v225_v54 = vmax.f32 %v570_v53, 0.0  ;;  %v201_v55 = vpop.f32.mrb[5].mxu0 }
 0x121   :  { %v224_v56 = vmax.f32 %v201_v55, 0.0  ;;  %655 = vmatprep.subr.bf16.mxu1 %v654_v52 }
 0x122   :  { %657 = vmatpush3.bf16.msra.mxu1 %v654_v52 }
 0x123   :  { %v658_v57 = vpack.c.bf16 %v225_v54, %v224_v56  ;;  %v573_v58 = vpop.f32.mrb[6].mxu0 }
 0x124   :  { %v227_v59 = vmax.f32 %v573_v58, 0.0  ;;  %v211_v60 = vpop.f32.mrb[7].mxu0 }
 0x125   :  { %v226_v61 = vmax.f32 %v211_v60, 0.0  ;;  %659 = vmatprep.subr.bf16.mxu1 %v658_v57 }
 0x126   :  { %661 = vmatpush3.bf16.msra.mxu1 %v658_v57 }
 0x127   :  { %v662_v62 = vpack.c.bf16 %v227_v59, %v226_v61 }
 0x129   :  { %663 = vmatprep.subr.bf16.mxu1 %v662_v62 }
 0x12a   :  { %665 = vmatpush3.bf16.msra.mxu1 %v662_v62 }
 0x12d   :  { %591 = vmatmul.mubr.msk.f32.vlgmr.msra.gmra.mrb[0].mxu1 %vm236_vm2, %v229_v63 }
 0x12e   :  { %593 = vmatprep.mubr.msk.f32.mxu1 %vm236_vm2, %v230_v0 }
 0x131   :  { %594 = vmatmul.mubr.msk.f32.gmra.mrb[2].mxu1 %vm236_vm2, %v231_v1 }
 0x132   :  { %596 = vmatprep.mubr.msk.f32.mxu1 %vm236_vm2, %v232_v2 }
 0x135   :  { %597 = vmatmul.mubr.msk.f32.gmra.mrb[4].mxu1 %vm236_vm2, %v233_v3 }
 0x136   :  { %599 = vmatprep.mubr.msk.f32.mxu1 %vm236_vm2, %v234_v4 }
 0x139   :  { %600 = vmatmul.mubr.msk.f32.gmra.mrb[6].mxu1 %vm236_vm2, %v235_v5 }
 0x200   :  { %v592_v8 = vpop.f32.mrb[0].mxu1 }
 0x201   :  { %v367_v9 = vmax.f32 %v592_v8, 0.0  ;;  %v327_v10 = vpop.f32.mrb[1].mxu1 }
 0x202   :  { %v366_v12 = vmax.f32 %v327_v10, 0.0 }
 0x203   :  { %v423_v13 = vmul.f32 %v390_v11, %v367_v9 }
 0x204   :  { %v422_v14 = vmul.f32 %v385_v6, %v366_v12  ;;  %v595_v15 = vpop.f32.mrb[2].mxu1 }
 0x205   :  { %v337_v17 = vpop.f32.mrb[3].mxu1  ;;  %v369_v19 = vmax.f32 %v595_v15, 0.0 }
 0x206   :  { %v430_v18 = vadd.f32 %v423_v13, %v422_v14  ;;  %v368_v20 = vmax.f32 %v337_v17, 0.0 }
 0x207   :  { %v425_v25 = vmul.f32 %v400_v16, %v369_v19 }
 0x208   :  { %v424_v21 = vmul.f32 %v395_v7, %v368_v20  ;;  %v598_v22 = vpop.f32.mrb[4].mxu1 }
 0x209   :  { %v347_v24 = vpop.f32.mrb[5].mxu1  ;;  %v371_v27 = vmax.f32 %v598_v22, 0.0 }
 0x20a   :  { %v431_v26 = vadd.f32 %v430_v18, %v424_v21  ;;  %v370_v28 = vmax.f32 %v347_v24, 0.0 }
 0x20b   :  { %v427_v34 = vmul.f32 %v410_v29, %v371_v27 }
 0x20c   :  { %v426_v30 = vmul.f32 %v405_v23, %v370_v28  ;;  %v432_v31 = vadd.f32 %v431_v26, %v425_v25  ;;  %v601_v32 = vpop.f32.mrb[6].mxu1 }
 0x20d   :  { %v357_v33 = vpop.f32.mrb[7].mxu1  ;;  %v373_v36 = vmax.f32 %v601_v32, 0.0 }
 0x20e   :  { %v433_v35 = vadd.f32 %v432_v31, %v426_v30  ;;  %v372_v37 = vmax.f32 %v357_v33, 0.0 }
 0x20f   :  { %v429_v42 = vmul.f32 %v420_v41, %v373_v36 }
 0x210   :  { %v428_v39 = vmul.f32 %v415_v38, %v372_v37  ;;  %v434_v40 = vadd.f32 %v433_v35, %v427_v34 }
 0x212   :  { %v435_v43 = vadd.f32 %v434_v40, %v428_v39 }
 0x214   :  { %v436_v44 = vadd.f32 %v435_v43, %v429_v42 }
 0x216   :  { %v437_v45 = vrot.slane %v436_v44, 4 }
 0x218   :  { %v438_v46 = vadd.f32 %v437_v45, %v436_v44 }
 0x21a   :  { %v439_v47 = vrot.slane %v438_v46, 2 }
 0x21c   :  { %v440_v48 = vadd.f32 %v439_v47, %v438_v46 }
 0x21e   :  { %v441_v49 = vrot.slane %v440_v48, 1 }
 0x220   :  { %v442_v50 = vadd.f32 %v441_v49, %v440_v48 }
 0x222   :  { %443 = vst [vmem:[#allocation2] sm:$0x1] %v442_v50 }
 0x223   :  { %681 = shalt.err (!%p678_p4)
}
 0x224   :  { %s682_s17 = scalar_lea.hbm %s911_s4, 16 }
 0x225   :  { %p683_p5 = scmp.ne.s32.totalorder %s911_s4, %s682_s17  ;;  %p686_p6 = scmp.lt.u32.totalorder %s682_s17, %s911_s4 }
 0x227   :  { %p688_p7 = pnand %p686_p6, %p683_p5 }
 0x229   :  { %691 = shalt.err (!%p688_p7)
}
 0x22a   :  { %453 = dma.vmem_to_hbm [thread:$0]  %s451_s13, 16, %s911_s4, [#allocation3]  }
 0x22b   :  { %692 = dma.done.wait [#allocation3], 16  }
 0x22c   :  { %693 = vsyncadd [#allocation3], 4294967280 }
 0x22d   :  { %457 = vsyncpa [#allocation3], 1 }

</bundles_post_ra>
